<compile_context>
chip_gen: v7x
topology: tpu7x:2x2x1
jax: 0.10.0
libtpu: 0.0.40
codegen_flags: <defaults>
</compile_context>

<pallas_src>
import numpy as np
import jax
import jax.numpy as jnp
from jax.experimental import pallas as pl
from jax.experimental.pallas import tpu as pltpu

_SUBLANES = 8
_LANES = 128
_VMEM_LIMIT = 32 * 1024 * 1024      # scoped-VMEM budget; safe on v5e/v6e/v7x
_MAX_ROW_TILE = 2048                # cont / tx: double-buffered blocks ~3 MB << VMEM
_MAX_GATHER_TILE = 512              # cat: per-row VMEM copy loop, amortizes step overhead


def _round_up(x, m):
    return ((x + m - 1) // m) * m


def _tile_rows(n, max_tile, align):
    """Pick (tile, n_pad, grid).  tile is a multiple of `align`, at most ~max_tile,
    and chosen so n_pad over-pads n by less than one (balanced) tile — avoids the
    old round_up(n, tile) ~2x blow-up for unlucky n (e.g. n = max_tile + 1)."""
    n = max(int(n), 1)
    nblocks = -(-n // max_tile)                 # cdiv
    tile = _round_up(-(-n // nblocks), align)   # balanced tile, aligned
    n_pad = _round_up(n, tile)
    return tile, n_pad, n_pad // tile


# ---------------- Kernel 1: categorical embedding (resident-table row gather) --
def _cat_gather_kernel(idx_ref, tbl_ref, out_ref):
    # idx_ref: SMEM scalar-prefetch [n_pad] int32, tbl_ref: resident VMEM [V, H],
    # out_ref: (tile, H) block.  Pure in-VMEM row copies; HBM traffic is just the
    # dense output block (table is loaded once and stays resident).
    tile = out_ref.shape[0]
    base = pl.program_id(0) * tile

    @pl.loop(0, tile)
    def _(r):
        out_ref[r, :] = tbl_ref[idx_ref[base + r], :]


def cat_embed(indices, table):
    """Gather rows `indices` (int32 [n]) from table [V, H] -> [n, H] (f32)."""
    n = int(indices.shape[0])
    vocab, h = int(table.shape[0]), int(table.shape[1])
    tile, n_pad, grid = _tile_rows(n, _MAX_GATHER_TILE, _SUBLANES)
    # pad indices with 0 (harmless: assumes vocab >= 1; padded rows are sliced off)
    idx = jnp.zeros((n_pad,), jnp.int32).at[:n].set(indices.astype(jnp.int32))
    out = pl.pallas_call(
        _cat_gather_kernel,
        grid_spec=pltpu.PrefetchScalarGridSpec(
            num_scalar_prefetch=1,
            grid=(grid,),
            in_specs=[pl.BlockSpec((vocab, h), lambda i, idx_ref: (0, 0))],   # resident
            out_specs=pl.BlockSpec((tile, h), lambda i, idx_ref: (i, 0)),
        ),
        out_shape=jax.ShapeDtypeStruct((n_pad, h), jnp.float32),
        compiler_params=pltpu.CompilerParams(
            dimension_semantics=("parallel",),       # rows independent, distinct blocks
            vmem_limit_bytes=_VMEM_LIMIT),
    )(idx, table)
    return out[:n]


# ---------------- Kernel 2: continuous Linear(1, H) (VPU broadcast, f32) -----
def _cont_embed_kernel(v_ref, w_ref, b_ref, out_ref):
    # v:[T,1]  w:[1,H]  b:[1,H]  -> out:[T,H]
    out_ref[...] = v_ref[...] * w_ref[...] + b_ref[...]


def cont_embed(values, w_row, b_row):
    n = int(values.shape[0])
    h = int(w_row.shape[1])
    tile, n_pad, grid = _tile_rows(n, _MAX_ROW_TILE, _SUBLANES)
    v2d = jnp.zeros((n_pad, 1), jnp.float32).at[:n, 0].set(values.astype(jnp.float32))
    out = pl.pallas_call(
        _cont_embed_kernel,
        grid_spec=pltpu.PrefetchScalarGridSpec(
            num_scalar_prefetch=0,
            grid=(grid,),
            in_specs=[pl.BlockSpec((tile, 1), lambda i: (i, 0)),
                      pl.BlockSpec((1, h), lambda i: (0, 0)),    # resident
                      pl.BlockSpec((1, h), lambda i: (0, 0))],   # resident
            out_specs=pl.BlockSpec((tile, h), lambda i: (i, 0)),
        ),
        out_shape=jax.ShapeDtypeStruct((n_pad, h), jnp.float32),
        compiler_params=pltpu.CompilerParams(
            dimension_semantics=("parallel",),
            vmem_limit_bytes=_VMEM_LIMIT),
    )(v2d, w_row, b_row)
    return out[:n]


# ---------------- Kernel 3: TransactionID Linear(371, H) (MXU, bf16 x bf16) --
def _tx_embed_kernel(x_ref, w_ref, b_ref, out_ref):
    # x:[T,Kp] bf16  w:[Kp,H] bf16  ->  f32 accumulation on the MXU
    out_ref[...] = jnp.dot(x_ref[...], w_ref[...],
                           preferred_element_type=jnp.float32) + b_ref[...]


def tx_embed(feats, wt_pad, b_row):
    n, d = int(feats.shape[0]), int(feats.shape[1])
    k_pad, h = int(wt_pad.shape[0]), int(wt_pad.shape[1])
    tile, n_pad, grid = _tile_rows(n, _MAX_ROW_TILE, 16)   # bf16 sublane pack = 16
    # Build the padded input directly in bf16 (no intermediate f32 materialization).
    x = (jnp.zeros((n_pad, k_pad), jnp.bfloat16)
         .at[:n, :d].set(feats.astype(jnp.bfloat16)))
    out = pl.pallas_call(
        _tx_embed_kernel,
        grid_spec=pltpu.PrefetchScalarGridSpec(
            num_scalar_prefetch=0,
            grid=(grid,),
            in_specs=[pl.BlockSpec((tile, k_pad), lambda i: (i, 0)),
                      pl.BlockSpec((k_pad, h), lambda i: (0, 0)),   # resident
                      pl.BlockSpec((1, h), lambda i: (0, 0))],      # resident
            out_specs=pl.BlockSpec((tile, h), lambda i: (i, 0)),
        ),
        out_shape=jax.ShapeDtypeStruct((n_pad, h), jnp.float32),
        compiler_params=pltpu.CompilerParams(
            dimension_semantics=("parallel",),
            vmem_limit_bytes=_VMEM_LIMIT),
    )(x, wt_pad, b_row)
    return out[:n]


# ---------------- Module wrapper (mirrors the PyTorch forward) ---------------
class FeatureEmbeddingPallas:
    TX_DIM = 371

    def __init__(self, all_node_types, cat_node_types, fn_mapping, hidden_size, key):
        self.cat_node_types = set(cat_node_types)
        self.fn_mapping = fn_mapping
        self.h = hidden_size
        self.k_pad = _round_up(self.TX_DIM, _LANES)     # 371 -> 384

        # All host-side parameter prep is done once here.
        self.cat_tables = {}      # nt -> [V, H] f32 (consumed directly by the gather kernel)
        self.cont_params = {}     # nt -> (w [H,1], b [H]) f32 (reference)
        self.cont_prepared = {}   # nt -> (w_row [1,H], b_row [1,H]) f32
        for nt in all_node_types:
            key, k = jax.random.split(key)
            if nt in self.cat_node_types:
                vocab = len(fn_mapping[nt])
                self.cat_tables[nt] = 0.1 * jax.random.normal(
                    k, (vocab, hidden_size), jnp.float32)
            elif nt != 'TransactionID':
                k1, k2 = jax.random.split(k)
                w = 0.1 * jax.random.normal(k1, (hidden_size, 1), jnp.float32)
                b = 0.1 * jax.random.normal(k2, (hidden_size,), jnp.float32)
                self.cont_params[nt] = (w, b)
                self.cont_prepared[nt] = (w[:, 0][None, :], b[None, :])

        key, k1, k2 = jax.random.split(key, 3)
        self.tx_weight = 0.1 * jax.random.normal(
            k1, (hidden_size, self.TX_DIM), jnp.float32)
        self.tx_bias = 0.1 * jax.random.normal(k2, (hidden_size,), jnp.float32)
        # W^T zero-padded along K (371->384) and stored bf16 (f32 MXU accumulation).
        # Design choice: activations are also fed bf16 (halves input DMA); verified
        # against a bf16 reference in __main__.
        self.tx_wt_pad = (jnp.zeros((self.k_pad, hidden_size), jnp.float32)
                          .at[:self.TX_DIM, :].set(self.tx_weight.T)
                          .astype(jnp.bfloat16))
        self.tx_b_row = self.tx_bias[None, :]

    def forward(self, node_ids, node_types, node_dst_value, n_feats):
        """Batched equivalent of the PyTorch list output: returns a single
        [len(node_ids), hidden] array whose row i is the embedding of node_ids[i]."""
        # Group nodes by type (python glue, mirrors the PyTorch forward loop).
        groups = {}
        for pos, nid in enumerate(node_ids):
            groups.setdefault(node_types[nid], []).append((pos, nid))

        out = jnp.zeros((len(node_ids), self.h), jnp.float32)
        # TODO(synk): fuse the per-type launches into one grouped pallas_call
        # (PrefetchScalarGridSpec group offsets + positions in the output
        # index_map / input_output_aliases) so one kernel writes the final buffer.
        for nt, members in groups.items():
            positions = jnp.asarray([p for p, _ in members], dtype=jnp.int32)
            nids = [n for _, n in members]
            if nt in self.cat_node_types:
                idx = jnp.asarray(
                    [self.fn_mapping[nt][node_dst_value[n]] for n in nids],
                    dtype=jnp.int32)
                emb = cat_embed(idx, self.cat_tables[nt])              # [n, H]
            elif nt == 'TransactionID':
                feats = jnp.stack(
                    [jnp.asarray(n_feats[n], dtype=jnp.float32) for n in nids])
                emb = tx_embed(feats, self.tx_wt_pad, self.tx_b_row)   # [n, H]
            else:
                vals = jnp.asarray([node_dst_value[n] for n in nids],
                                   dtype=jnp.float32)
                w_row, b_row = self.cont_prepared[nt]
                emb = cont_embed(vals, w_row, b_row)                   # [n, H]
            out = out.at[positions].set(emb)   # kernels emit hidden=32 directly
        return out

    # pure-JAX reference (f32) for validation
    def forward_ref(self, node_ids, node_types, node_dst_value, n_feats):
        out = []
        for nid in node_ids:
            nt = node_types[nid]
            if nt in self.cat_node_types:
                i = self.fn_mapping[nt][node_dst_value[nid]]
                out.append(self.cat_tables[nt][i])
            elif nt == 'TransactionID':
                x = jnp.asarray(n_feats[nid], dtype=jnp.float32)
                out.append(jnp.dot(self.tx_weight, x) + self.tx_bias)
            else:
                w, b = self.cont_params[nt]
                v = jnp.float32(node_dst_value[nid])
                out.append(w[:, 0] * v + b)
        return out


if __name__ == "__main__":
    key = jax.random.PRNGKey(0)

    hidden_size = 32
    all_node_types = ['card1', 'addr1', 'C1', 'TransactionID']
    cat_node_types = {'card1', 'addr1'}
    fn_mapping = {
        'card1': {f'c{i}': i for i in range(16)},
        'addr1': {f'a{i}': i for i in range(8)},
    }

    key, kmod, kfeat, kidx = jax.random.split(key, 4)
    model = FeatureEmbeddingPallas(all_node_types, cat_node_types,
                                   fn_mapping, hidden_size, kmod)

    # 8 nodes: 2 TransactionID, 2 card1, 2 addr1, 2 continuous (C1)
    node_ids = [0, 1, 2, 3, 4, 5, 6, 7]
    node_types = {0: 'TransactionID', 1: 'card1', 2: 'addr1', 3: 'C1',
                  4: 'card1', 5: 'C1', 6: 'TransactionID', 7: 'addr1'}
    node_dst_value = {1: 'c3', 2: 'a2', 3: 1.5, 4: 'c7', 5: -0.25, 7: 'a5'}

    tx_feats = jax.random.normal(kfeat, (2, 371), jnp.float32)
    n_feats = {0: tx_feats[0], 6: tx_feats[1]}   # stand-in for n_feats.loc[nid]

    out = model.forward(node_ids, node_types, node_dst_value, n_feats)
    jax.block_until_ready(out)

    # Check against the pure-f32 reference: gather / elementwise paths exact
    # (tight tolerance); TransactionID path uses bf16 operands -> looser.
    refs = model.forward_ref(node_ids, node_types, node_dst_value, n_feats)
    for i, nid in enumerate(node_ids):
        if node_types[nid] == 'TransactionID':
            rtol, atol = 2e-2, 2e-2
        else:
            rtol, atol = 1e-5, 1e-6
        np.testing.assert_allclose(np.asarray(out[i]), np.asarray(refs[i]),
                                   rtol=rtol, atol=atol)

    # Tight check of the TransactionID kernel against a bf16 reference with
    # identical numerics (bf16 operands, f32 accumulation).
    tx_rows = [i for i, nid in enumerate(node_ids)
               if node_types[nid] == 'TransactionID']
    tx_nids = [node_ids[i] for i in tx_rows]
    feats_bf16 = jnp.stack(
        [jnp.asarray(n_feats[n], jnp.float32) for n in tx_nids]).astype(jnp.bfloat16)
    wt_bf16 = model.tx_weight.T.astype(jnp.bfloat16)
    tx_ref = (jnp.dot(feats_bf16, wt_bf16, preferred_element_type=jnp.float32)
              + model.tx_bias)
    np.testing.assert_allclose(np.asarray(out[jnp.asarray(tx_rows)]),
                               np.asarray(tx_ref), rtol=1e-5, atol=1e-5)

    # Extra exact check of the tiled in-kernel gather on a larger index set.
    big_idx = jax.random.randint(kidx, (37,), 0, 16).astype(jnp.int32)
    np.testing.assert_array_equal(
        np.asarray(cat_embed(big_idx, model.cat_tables['card1'])),
        np.asarray(model.cat_tables['card1'][big_idx]))

    print("KERNEL_OK")
</pallas_src>

<mosaic_0001>
module attributes {stable_mosaic.version = 11 : i64} {
  func.func @_tx_embed_kernel(%arg0: i32, %arg1: memref<16x384xbf16, #tpu.memory_space<vmem>>, %arg2: memref<384x32xbf16, #tpu.memory_space<vmem>>, %arg3: memref<1x32xf32, #tpu.memory_space<vmem>>, %arg4: memref<16x32xf32, #tpu.memory_space<vmem>>) attributes {dimension_semantics = [#tpu.dimension_semantics<parallel>], iteration_bounds = array<i64: 1>, scalar_prefetch = 0 : i64, scratch_operands = 0 : i64, tpu.core_type = #tpu.core_type<tc>, window_params = [{transform_indices = @transform_0, window_bounds = array<i64: 16, 384>}, {pipeline_mode = #tpu.pipeline_mode<synchronous>, transform_indices = @transform_1, window_bounds = array<i64: 384, 32>}, {pipeline_mode = #tpu.pipeline_mode<synchronous>, transform_indices = @transform_2, window_bounds = array<i64: 1, 32>}, {transform_indices = @transform_3, window_bounds = array<i64: 16, 32>}]} {
    %c0 = arith.constant 0 : index
    %c0_0 = arith.constant 0 : index
    %0 = vector.load %arg1[%c0, %c0_0] : memref<16x384xbf16, #tpu.memory_space<vmem>>, vector<16x384xbf16>
    %c0_1 = arith.constant 0 : index
    %c0_2 = arith.constant 0 : index
    %1 = vector.load %arg2[%c0_1, %c0_2] : memref<384x32xbf16, #tpu.memory_space<vmem>>, vector<384x32xbf16>
    %cst = arith.constant dense<0.000000e+00> : vector<16x32xf32>
    %2 = tpu.matmul %0, %1, %cst {dimension_numbers = #tpu.dot_dimension_numbers<[1], [0], [0], [1], [0, 0, 1, 1], [], []>} : vector<16x384xbf16>, vector<384x32xbf16>, vector<16x32xf32> -> vector<16x32xf32>
    %c0_3 = arith.constant 0 : index
    %c0_4 = arith.constant 0 : index
    %3 = vector.load %arg3[%c0_3, %c0_4] : memref<1x32xf32, #tpu.memory_space<vmem>>, vector<1x32xf32>
    %4 = vector.broadcast %3 : vector<1x32xf32> to vector<16x32xf32>
    %5 = arith.addf %2, %4 : vector<16x32xf32>
    %c0_5 = arith.constant 0 : index
    %c0_6 = arith.constant 0 : index
    %6 = vector.load %arg4[%c0_5, %c0_6] : memref<16x32xf32, #tpu.memory_space<vmem>>, vector<16x32xf32>
    tpu.vector_store %arg4[%c0_5, %c0_6], %5 {strides = array<i32>} : memref<16x32xf32, #tpu.memory_space<vmem>>, vector<16x32xf32>,
    return
  }
  func.func @transform_0(%arg0: i32) -> (i32, i32) {
    %c0_i32 = arith.constant 0 : i32
    %c0_i32_0 = arith.constant 0 : i32
    return %arg0, %c0_i32 : i32, i32
  }
  func.func @transform_1(%arg0: i32) -> (i32, i32) {
    %c0_i32 = arith.constant 0 : i32
    %c0_i32_0 = arith.constant 0 : i32
    %c0_i32_1 = arith.constant 0 : i32
    return %c0_i32, %c0_i32_0 : i32, i32
  }
  func.func @transform_2(%arg0: i32) -> (i32, i32) {
    %c0_i32 = arith.constant 0 : i32
    %c0_i32_0 = arith.constant 0 : i32
    %c0_i32_1 = arith.constant 0 : i32
    return %c0_i32, %c0_i32_0 : i32, i32
  }
  func.func @transform_3(%arg0: i32) -> (i32, i32) {
    %c0_i32 = arith.constant 0 : i32
    %c0_i32_0 = arith.constant 0 : i32
    return %arg0, %c0_i32 : i32, i32
  }
}

</mosaic_0001>

<bundles_post_ra>
// kernel: tpu_custom_call.1
= control target key start
LH: loop header
LB: loop body
LE: loop exit
PB: predicated region body
PF: predicated region fallthrough
CT: control target
= control target key end

     0   :  { %v472_v2 = vmov 0.0   ;;  %vm473_vm0 = vmmov 0   ;;  %s593_s0 = inlined_call_operand.vmem [shape: bf16[16,384], index: 0, kind: input, shape index: {}]   ;;  %s594_s1 = inlined_call_operand.vmem [shape: bf16[384,32], index: 1, kind: input, shape index: {}]   ;;  %s595_s2 = inlined_call_operand.vmem [shape: f32[1,32], index: 2, kind: input, shape index: {}]   ;;  %s596_s3 = inlined_call_operand.hbm [shape: f32[16,32], index: 3, kind: output, shape index: {}]  }
   0x1   :  { %v420_v0 = vld [vmem:[%s594_s1 + $0x40] sm:$0xff]   ;;  %395 = vmatprep.subr.bf16.mxu1 %v472_v2  ;;  %411 = vmatprep.mubr.msk.bf16.mxu1 %vm473_vm0, %v472_v2  ;;  %v423_v4 = vld [vmem:[%s594_s1 + $0x48] sm:$0xff]   ;;  %v426_v7 = vld [vmem:[%s594_s1 + $0x50] sm:$0xff]  }
   0x2   :  { %v421_v1 = vld [vmem:[%s594_s1] sm:$0xff]   ;;  %364 = vmatprep.subr.bf16.mxu0 %v420_v0  ;;  %v424_v5 = vld [vmem:[%s594_s1 + $0x8] sm:$0xff]   ;;  %v427_v8 = vld [vmem:[%s594_s1 + $0x10] sm:$0xff]  }
   0x3   :  { %v422_v3 = vld [vmem:[%s594_s1 + $0x80] sm:$0xff]   ;;  %365 = vmatpush3.bf16.msra.mxu0 %v421_v1  ;;  %v425_v6 = vld [vmem:[%s594_s1 + $0x88] sm:$0xff]   ;;  %v428_v9 = vld [vmem:[%s594_s1 + $0x90] sm:$0xff]  }
   0x4   :  { %396 = vmatpush3.bf16.msra.mxu1 %v422_v3  ;;  %366 = vmatprep.subr.bf16.mxu0 %v423_v4  ;;  %v429_v10 = vld [vmem:[%s594_s1 + $0x58] sm:$0xff]   ;;  %v432_v13 = vld [vmem:[%s594_s1 + $0x60] sm:$0xff]   ;;  %v435_v16 = vld [vmem:[%s594_s1 + $0x68] sm:$0xff]  }
   0x5   :  { %397 = vmatprep.subr.bf16.mxu1 %v472_v2  ;;  %v430_v11 = vld [vmem:[%s594_s1 + $0x18] sm:$0xff]   ;;  %v433_v14 = vld [vmem:[%s594_s1 + $0x20] sm:$0xff]   ;;  %v436_v17 = vld [vmem:[%s594_s1 + $0x28] sm:$0xff]  }
   0x6   :  { %v431_v12 = vld [vmem:[%s594_s1 + $0x98] sm:$0xff]   ;;  %v434_v15 = vld [vmem:[%s594_s1 + $0xa0] sm:$0xff]   ;;  %v437_v18 = vld [vmem:[%s594_s1 + $0xa8] sm:$0xff]  }
   0x7   :  { %367 = vmatpush3.bf16.msra.mxu0 %v424_v5  ;;  %v438_v19 = vld [vmem:[%s594_s1 + $0x70] sm:$0xff]   ;;  %v441_v22 = vld [vmem:[%s594_s1 + $0x78] sm:$0xff]  }
   0x8   :  { %398 = vmatpush3.bf16.msra.mxu1 %v425_v6  ;;  %368 = vmatprep.subr.bf16.mxu0 %v426_v7  ;;  %v439_v20 = vld [vmem:[%s594_s1 + $0x30] sm:$0xff]  }
   0x9   :  { %399 = vmatprep.subr.bf16.mxu1 %v472_v2  ;;  %v440_v21 = vld [vmem:[%s594_s1 + $0xb0] sm:$0xff]  }
   0xa   :  { %v445_v23 = vld [vmem:[%s593_s0 + $0x4] ss:$12 sps:$4 sm:$0xff]  }
   0xb   :  { %369 = vmatpush3.bf16.msra.mxu0 %v427_v8  ;;  %267 = vmatprep.mubr.bf16.mxu0 %v445_v23 }
   0xc   :  { %400 = vmatpush3.bf16.msra.mxu1 %v428_v9  ;;  %370 = vmatprep.subr.bf16.mxu0 %v429_v10 }
   0xd   :  { %401 = vmatprep.subr.bf16.mxu1 %v472_v2 }
   0xf   :  { %371 = vmatpush3.bf16.msra.mxu0 %v430_v11 }
  0x10   :  { %402 = vmatpush3.bf16.msra.mxu1 %v431_v12  ;;  %372 = vmatprep.subr.bf16.mxu0 %v432_v13 }
  0x11   :  { %403 = vmatprep.subr.bf16.mxu1 %v472_v2 }
  0x13   :  { %373 = vmatpush3.bf16.msra.mxu0 %v433_v14 }
  0x14   :  { %404 = vmatpush3.bf16.msra.mxu1 %v434_v15  ;;  %374 = vmatprep.subr.bf16.mxu0 %v435_v16 }
  0x15   :  { %405 = vmatprep.subr.bf16.mxu1 %v472_v2 }
  0x17   :  { %375 = vmatpush3.bf16.msra.mxu0 %v436_v17 }
  0x18   :  { %406 = vmatpush3.bf16.msra.mxu1 %v437_v18  ;;  %376 = vmatprep.subr.bf16.mxu0 %v438_v19 }
  0x19   :  { %407 = vmatprep.subr.bf16.mxu1 %v472_v2 }
  0x1a   :  { %8 = vsyncpa [#allocation3], 0  ;;  %v442_v24 = vld [vmem:[%s594_s1 + $0x38] sm:$0xff]   ;;  %v443_v26 = vld [vmem:[%s593_s0] ss:$12 sps:$4 sm:$0xff]   ;;  %vm317_vm1 = vcmask 261120  }
  0x1b   :  { %377 = vmatpush3.bf16.msra.mxu0 %v439_v20  ;;  %v446_v25 = vld [vmem:[%s594_s1 + $0xb8] sm:$0xff]   ;;  %v447_v27 = vld [vmem:[%s593_s0 + $0x8] ss:$12 sps:$4 sm:$0xff]   ;;  %v336_v30 = vld [vmem:[%s595_s2] ss:$0 sm:$0xff]  ;;  %s474_s1 = smov [#allocation2]  }
  0x1c   :  { %408 = vmatpush3.bf16.msra.mxu1 %v440_v21  ;;  %378 = vmatprep.subr.bf16.mxu0 %v441_v22  ;;  %s325_s0 = sshll.u32 %s474_s1, 4  ;;  %s326_s0 = int_to_ptr.vmem [resolvable:$true] %s325_s0 }
  0x1d   :  { %409 = vmatprep.subr.bf16.mxu1 %v472_v2  ;;  %s448_s14 = scalar_lea.vmem %s326_s0, 256  ;;  %p453_p1 = scmp.lt.s32.totalorder %s326_s0, %s326_s0 }
  0x1e   :  { %p449_p0 = scmp.ne.s32.totalorder %s326_s0, %s448_s14  ;;  %p454_p2 = scmp.lt.s32.totalorder %s448_s14, %s448_s14 }
  0x1f   :  { %379 = vmatpush3.bf16.msra.mxu0 %v442_v24 }
  0x20   :  { %410 = vmatpush3.bf16.msra.mxu1 %v446_v25  ;;  %p455_p3 = por %p454_p2, %p453_p1 }
  0x22   :  { %268 = vmatmul.mubr.bf16.vlgmr.msra.gmra.mrb[0].mxu0 %v443_v26  ;;  %p456_p4 = pnand %p455_p3, %p449_p0 }
  0x23   :  { %412 = vmatmul.mubr.bf16.vlgmr.msra.gmra.mrb[0].mxu1 %v447_v27 }
  0xf5   :  { %v380_v28 = vpop.f32.mrb[0].mxu0 }
  0xf6   :  { %v381_v29 = vpop.f32.mrb[1].mxu0  ;;  %v310_v31 = vpop.f32.mrb[0].mxu1 }
  0xf7   :  { %v382_v32 = vadd.f32 %v381_v29, %v380_v28  ;;  %v383_v33 = vpop.f32.mrb[2].mxu0  ;;  %v413_v34 = vpop.f32.mrb[1].mxu1 }
  0xf8   :  { %v384_v35 = vpop.f32.mrb[3].mxu0  ;;  %v313_v36 = vpop.f32.mrb[2].mxu1 }
  0xf9   :  { %v270_v37 = vadd.f32 %v382_v32, %v336_v30  ;;  %v385_v38 = vadd.f32 %v384_v35, %v383_v33  ;;  %v414_v39 = vpop.f32.mrb[3].mxu1 }
  0xfb   :  { %v311_v40 = vadd.f32 %v310_v31, %v270_v37  ;;  %v273_v41 = vadd.f32 %v385_v38, %v336_v30 }
  0xfd   :  { %318 = vst.msk [vmem:[#allocation2] sm:$0xff] %vm317_vm1, %v311_v40  ;;  %v314_v42 = vadd.f32 %v313_v36, %v273_v41 }
  0xff   :  { %319 = vst.msk [vmem:[#allocation2 + $0x8] sm:$0xff] %vm317_vm1, %v314_v42 }
 0x100   :  { %459 = shalt.err (!%p456_p4)
}
 0x101   :  { %s460_s16 = scalar_lea.hbm %s596_s3, 256 }
 0x102   :  { %p461_p5 = scmp.ne.s32.totalorder %s596_s3, %s460_s16  ;;  %p464_p6 = scmp.lt.u32.totalorder %s460_s16, %s596_s3 }
 0x104   :  { %p466_p7 = pnand %p464_p6, %p461_p5 }
 0x106   :  { %469 = shalt.err (!%p466_p7)
}
 0x107   :  { %s475_s21 = smov 128   ;;  %s476_s22 = smov 8  }
 0x108   :  { %331 = dma.vmem_to_hbm [thread:$0]  %s326_s0, 256, %s596_s3, [#allocation3], %s475_s21, %s475_s21, %s476_s22  }
 0x109   :  { %470 = dma.done.wait [#allocation3], 256  }
 0x10a   :  { %471 = vsyncadd [#allocation3], 4294967040 }
 0x10b   :  { %335 = vsyncpa [#allocation3], 1 }

</bundles_post_ra>
